<compile_context>
chip_gen: v7x
topology: tpu7x:2x2x1
jax: 0.10.0
libtpu: 0.0.40
codegen_flags: <defaults>
</compile_context>

<pallas_src>
import functools
import math

import jax
import jax.numpy as jnp
from jax.experimental import pallas as pl
from jax.experimental.pallas import tpu as pltpu


# ---------------------------------------------------------------------------
# helpers
# ---------------------------------------------------------------------------
def _pick_seq_tile(n, cap=256):
    """Largest multiple of 8 that divides n and is <= cap (else n)."""
    t = min(n, cap)
    t -= t % 8
    while t >= 8:
        if n % t == 0:
            return t
        t -= 8
    return n


def _pick_channel_tile(d, cap=512):
    for c in (cap, 256, 128):
        if c <= d and d % c == 0:
            return c
    return d


def _pick_inner_seq_block(L):
    """Sublane-aligned block size for the causal tap loop inside the conv."""
    for ts in (16, 8):
        if L % ts == 0 and L > ts:
            return ts
    return L


def _full_spec(a):
    """BlockSpec covering the whole (small, resident) array regardless of grid."""
    return pl.BlockSpec(a.shape, lambda *_: (0,) * a.ndim)


# ---------------------------------------------------------------------------
# Kernel 1: implicit filter  k = modulation(t, MLP(z))
#   grid = (L // tl,)  (parallel over sequence tiles)
# ---------------------------------------------------------------------------
def _hyena_filter_kernel(z_ref, t_ref, freq_ref, deltas_abs_ref,
                         w0_ref, b0_ref, w1_ref, b1_ref, w2_ref, b2_ref,
                         wf_ref, h_ref, *, mod_shift, modulate):
    # z_ref: (tl, emb_dim)  t_ref: (tl, 1)  weights resident in VMEM
    # h_ref: (tl, d_model)  (d_model lane-dense)
    h = jnp.dot(z_ref[...], w0_ref[...], preferred_element_type=jnp.float32) + b0_ref[...]
    h = jnp.sin(freq_ref[...] * h)
    h = jnp.dot(h, w1_ref[...], preferred_element_type=jnp.float32) + b1_ref[...]
    h = jnp.sin(freq_ref[...] * h)
    h = jnp.dot(h, w2_ref[...], preferred_element_type=jnp.float32) + b2_ref[...]
    h = jnp.sin(freq_ref[...] * h)
    h = jnp.dot(h, wf_ref[...], preferred_element_type=jnp.float32)     # (tl, d_model)
    if modulate:
        decay = jnp.exp(-t_ref[...] * deltas_abs_ref[...])              # (tl, d_model)
        h = h * (decay + mod_shift)
    h_ref[...] = h.astype(h_ref.dtype)


def hyena_filter_filter(params, L, *, seq_tile=None):
    """HyenaFilter.filter(L): returns the implicit filter, shape (L, d_model)."""
    z = params['z'][0, :L]                      # (L, emb_dim)
    t = params['t'][0, :L]                      # (L, 1)
    emb_dim = z.shape[-1]
    order = params['freq'].shape[-1]
    d_model = params['w_out'].shape[0]

    tl = seq_tile if seq_tile is not None else _pick_seq_tile(L)
    assert L % tl == 0, (L, tl)

    # PyTorch Linear weights are (out, in); transpose once so the kernel runs
    # plain row-major matmuls on the MXU.
    w0 = jnp.transpose(params['w_in']);   b0 = params['b_in'].reshape(1, order)
    w1 = jnp.transpose(params['w_mid1']); b1 = params['b_mid1'].reshape(1, order)
    w2 = jnp.transpose(params['w_mid2']); b2 = params['b_mid2'].reshape(1, order)
    wf = jnp.transpose(params['w_out'])                                   # (order, d_model)
    freq = params['freq']                                                 # (1, order)
    deltas_abs = jnp.abs(params['deltas'])                                # (1, d_model)

    kern = functools.partial(_hyena_filter_kernel,
                             mod_shift=float(params['mod_shift']),
                             modulate=bool(params['modulate']))

    return pl.pallas_call(
        kern,
        out_shape=jax.ShapeDtypeStruct((L, d_model), jnp.float32),
        grid=(L // tl,),
        in_specs=[
            pl.BlockSpec((tl, emb_dim), lambda i: (i, 0)),
            pl.BlockSpec((tl, 1), lambda i: (i, 0)),
            _full_spec(freq), _full_spec(deltas_abs),
            _full_spec(w0), _full_spec(b0),
            _full_spec(w1), _full_spec(b1),
            _full_spec(w2), _full_spec(b2),
            _full_spec(wf),
        ],
        out_specs=pl.BlockSpec((tl, d_model), lambda i: (i, 0)),
        compiler_params=pltpu.CompilerParams(
            dimension_semantics=("parallel",),
            vmem_limit_bytes=48 * 1024 * 1024),
    )(z, t, freq, deltas_abs, w0, b0, w1, b1, w2, b2, wf)


# ---------------------------------------------------------------------------
# Kernel 2: fftconv == causal depthwise conv over the sequence + bias skip
#   grid = (B, d_model // td)  (both parallel); x presented as (B, L, d_model)
#   so d_model is lane-dense.  The tap loop is blocked over sublane-aligned
#   output-sequence blocks: block m only sees taps j < (m+1)*ts, which skips
#   the guaranteed-zero contributions (causality) at block granularity.
# ---------------------------------------------------------------------------
def _causal_conv_kernel(x_ref, k_ref, b_ref, o_ref, *, seq_block):
    # x_ref: (1, L, td)  k_ref: (L, td)  b_ref: (1, td)  o_ref: (1, L, td)
    L, td = k_ref.shape
    ts = seq_block
    x = x_ref[0]                                            # (L, td)
    k = k_ref[...]                                          # (L, td), f32
    b = b_ref[...]                                          # (1, td)
    # Pad only ts zero rows in front: any in-block negative offset stays inside.
    xpad = jnp.concatenate([jnp.zeros((ts, td), dtype=x.dtype), x], axis=0)  # (L+ts, td)

    # Direct causal conv: y[i,c] = sum_{j<=i} k[j,c] * x[i-j,c] (+ x*D skip).
    # TODO(synk): FFT / fori_loop path for long sequences (static unroll here).
    for m in range(L // ts):
        lo = m * ts
        acc = x[lo:lo + ts].astype(jnp.float32) * b          # skip connection u * D
        for j in range(lo + ts):
            # xs[s,c] = x[lo + s - j, c]  (zero when lo + s - j < 0)
            xs = xpad[lo - j + ts: lo - j + 2 * ts]
            acc = acc + k[j:j + 1, :] * xs
        o_ref[0, lo:lo + ts, :] = acc.astype(o_ref.dtype)


def hyena_fftconv(x, k_ld, bias, *, channel_tile=None, inner_seq_block=None):
    """fftconv(u, k, D): x (B, d_model, L), k_ld (L, d_model), bias (d_model,)."""
    B, d, L = x.shape
    assert k_ld.shape == (L, d), (k_ld.shape, (L, d))
    assert bias.shape == (d,)

    xt = jnp.transpose(x, (0, 2, 1))          # (B, L, d): d_model lane-dense
    b2 = bias.reshape(1, d).astype(jnp.float32)

    td = channel_tile if channel_tile is not None else _pick_channel_tile(d)
    assert d % td == 0, (d, td)
    ts = inner_seq_block if inner_seq_block is not None else _pick_inner_seq_block(L)
    assert L % ts == 0, (L, ts)

    kern = functools.partial(_causal_conv_kernel, seq_block=ts)

    yt = pl.pallas_call(
        kern,
        out_shape=jax.ShapeDtypeStruct((B, L, d), x.dtype),
        grid=(B, d // td),
        in_specs=[
            pl.BlockSpec((1, L, td), lambda b, c: (b, 0, c)),
            pl.BlockSpec((L, td), lambda b, c: (0, c)),
            pl.BlockSpec((1, td), lambda b, c: (0, c)),
        ],
        out_specs=pl.BlockSpec((1, L, td), lambda b, c: (b, 0, c)),
        compiler_params=pltpu.CompilerParams(
            dimension_semantics=("parallel", "parallel"),
            vmem_limit_bytes=48 * 1024 * 1024),
    )(xt, k_ld.astype(jnp.float32), b2)
    return jnp.transpose(yt, (0, 2, 1))       # back to (B, d_model, L)


def hyena_filter_forward(x, params, L=None, k=None, bias=None, *,
                         seq_tile=None, channel_tile=None):
    """HyenaFilter.forward(x, L, k=None, bias=None) -> (B, d_model, L)."""
    B, d, Lx = x.shape
    if L is None:
        L = Lx
    assert L == Lx, "demo supports L == x.shape[-1] (as used by HyenaOperator)"
    if bias is None:
        bias = params['bias']                 # the module's learned bias param
    if k is None:
        k_ld = hyena_filter_filter(params, L, seq_tile=seq_tile)   # (L, d_model)
    else:
        k_ld = jnp.transpose(k)               # external k given as (d_model, L)
    return hyena_fftconv(x, k_ld, bias, channel_tile=channel_tile)


# ---------------------------------------------------------------------------
# Parameter construction (deterministic, mirrors the torch module's init)
# ---------------------------------------------------------------------------
def init_hyena_filter_params(key, d_model, emb_dim=3, order=16, seq_len=64,
                             w=1.0, fast_decay_pct=0.3, slow_decay_pct=1.5,
                             target=1e-2, mod_shift=0.05, modulate=True):
    assert emb_dim % 2 != 0 and emb_dim >= 3
    ks = jax.random.split(key, 5)

    def linear_init(k_, fan_in, fan_out):
        bound = 1.0 / math.sqrt(fan_in)
        kw, kb = jax.random.split(k_)
        W = jax.random.uniform(kw, (fan_out, fan_in), minval=-bound, maxval=bound,
                               dtype=jnp.float32)
        b = jax.random.uniform(kb, (fan_out,), minval=-bound, maxval=bound,
                               dtype=jnp.float32)
        return W, b

    w_in, b_in = linear_init(ks[0], emb_dim, order)
    w_mid1, b_mid1 = linear_init(ks[1], order, order)
    w_mid2, b_mid2 = linear_init(ks[2], order, order)
    w_out, _ = linear_init(ks[3], order, d_model)          # final layer: bias=False
    freq = w * jnp.ones((1, order), jnp.float32)           # Sin activation freq
    bias = jax.random.normal(ks[4], (d_model,), dtype=jnp.float32)

    # PositionalEmbedding buffers
    bands = (emb_dim - 1) // 2
    t = jnp.linspace(0.0, 1.0, seq_len, dtype=jnp.float32)[None, :, None]
    t_rescaled = jnp.linspace(0.0, seq_len - 1, seq_len, dtype=jnp.float32)[None, :, None]
    wang = 2.0 * math.pi * t_rescaled / seq_len
    f = jnp.linspace(1e-4, bands - 1, bands, dtype=jnp.float32)[None, None]
    zc = jnp.exp(-1j * (f * wang).astype(jnp.complex64))
    z = jnp.concatenate([t, jnp.real(zc), jnp.imag(zc)], axis=-1).astype(jnp.float32)

    # ExponentialModulation deltas
    max_decay = math.log(target) / fast_decay_pct
    min_decay = math.log(target) / slow_decay_pct
    deltas = jnp.linspace(min_decay, max_decay, d_model, dtype=jnp.float32)[None, :]

    return dict(w_in=w_in, b_in=b_in, w_mid1=w_mid1, b_mid1=b_mid1,
                w_mid2=w_mid2, b_mid2=b_mid2, w_out=w_out, freq=freq,
                bias=bias, z=z, t=t, deltas=deltas,
                mod_shift=mod_shift, modulate=modulate)


# ---------------------------------------------------------------------------
# Pure-JAX references (faithful ports of the torch forward, FFT and all)
# ---------------------------------------------------------------------------
def ref_filter(params, L):
    z = params['z'][:, :L]
    t = params['t'][:, :L]
    h = z @ params['w_in'].T + params['b_in']
    h = jnp.sin(params['freq'] * h)
    h = h @ params['w_mid1'].T + params['b_mid1']
    h = jnp.sin(params['freq'] * h)
    h = h @ params['w_mid2'].T + params['b_mid2']
    h = jnp.sin(params['freq'] * h)
    h = h @ params['w_out'].T
    if params['modulate']:
        decay = jnp.exp(-t * jnp.abs(params['deltas']))
        h = h * (decay + params['mod_shift'])
    return h                                                # (1, L, d_model)


def ref_fftconv(u, k, D):
    # u: (B, d, L), k: (d, L), D: (d,) -- exact port of torch fftconv
    seqlen = u.shape[-1]
    fft_size = 2 * seqlen
    k_f = jnp.fft.rfft(k, n=fft_size) / fft_size
    u_f = jnp.fft.rfft(u, n=fft_size)
    y = jnp.fft.irfft(u_f * k_f, n=fft_size, norm='forward')[..., :seqlen]
    return (y + u * D[:, None]).astype(u.dtype)


if __name__ == "__main__":
    B, d_model, L = 2, 256, 64
    emb_dim, order = 3, 16

    key = jax.random.PRNGKey(0)
    kp, kx = jax.random.split(key)
    params = init_hyena_filter_params(kp, d_model, emb_dim=emb_dim, order=order,
                                      seq_len=L)
    x = jax.random.normal(kx, (B, d_model, L), dtype=jnp.float32)

    # Pallas forward (filter kernel + causal-conv kernel); small tiles so the
    # grids actually take multiple steps.
    y = hyena_filter_forward(x, params, L=L, seq_tile=16, channel_tile=128)
    y = jax.block_until_ready(y)

    # Pallas filter alone (for a tighter check of kernel 1).
    h_ker = jax.block_until_ready(hyena_filter_filter(params, L, seq_tile=16))

    # References
    h_ref = ref_filter(params, L)                           # (1, L, d_model)
    y_ref = ref_fftconv(x, jnp.transpose(h_ref[0]), params['bias'])

    assert y.shape == (B, d_model, L)
    assert h_ker.shape == (L, d_model)
    assert jnp.allclose(h_ker, h_ref[0], atol=1e-4, rtol=1e-4), \
        float(jnp.max(jnp.abs(h_ker - h_ref[0])))
    assert jnp.allclose(y, y_ref, atol=2e-3, rtol=2e-3), \
        float(jnp.max(jnp.abs(y - y_ref)))
    print("KERNEL_OK")
</pallas_src>

<mosaic_0001>
module attributes {stable_mosaic.version = 11 : i64} {
  func.func @_hyena_filter_kernel(%arg0: i32, %arg1: memref<16x3xf32, #tpu.memory_space<vmem>>, %arg2: memref<16x1xf32, #tpu.memory_space<vmem>>, %arg3: memref<1x16xf32, #tpu.memory_space<vmem>>, %arg4: memref<1x256xf32, #tpu.memory_space<vmem>>, %arg5: memref<3x16xf32, #tpu.memory_space<vmem>>, %arg6: memref<1x16xf32, #tpu.memory_space<vmem>>, %arg7: memref<16x16xf32, #tpu.memory_space<vmem>>, %arg8: memref<1x16xf32, #tpu.memory_space<vmem>>, %arg9: memref<16x16xf32, #tpu.memory_space<vmem>>, %arg10: memref<1x16xf32, #tpu.memory_space<vmem>>, %arg11: memref<16x256xf32, #tpu.memory_space<vmem>>, %arg12: memref<16x256xf32, #tpu.memory_space<vmem>>) attributes {dimension_semantics = [#tpu.dimension_semantics<parallel>], iteration_bounds = array<i64: 4>, scalar_prefetch = 0 : i64, scratch_operands = 0 : i64, tpu.core_type = #tpu.core_type<tc>, window_params = [{transform_indices = @transform_0, window_bounds = array<i64: 16, 3>}, {transform_indices = @transform_1, window_bounds = array<i64: 16, 1>}, {pipeline_mode = #tpu.pipeline_mode<synchronous>, transform_indices = @transform_2, window_bounds = array<i64: 1, 16>}, {pipeline_mode = #tpu.pipeline_mode<synchronous>, transform_indices = @transform_3, window_bounds = array<i64: 1, 256>}, {pipeline_mode = #tpu.pipeline_mode<synchronous>, transform_indices = @transform_4, window_bounds = array<i64: 3, 16>}, {pipeline_mode = #tpu.pipeline_mode<synchronous>, transform_indices = @transform_5, window_bounds = array<i64: 1, 16>}, {pipeline_mode = #tpu.pipeline_mode<synchronous>, transform_indices = @transform_6, window_bounds = array<i64: 16, 16>}, {pipeline_mode = #tpu.pipeline_mode<synchronous>, transform_indices = @transform_7, window_bounds = array<i64: 1, 16>}, {pipeline_mode = #tpu.pipeline_mode<synchronous>, transform_indices = @transform_8, window_bounds = array<i64: 16, 16>}, {pipeline_mode = #tpu.pipeline_mode<synchronous>, transform_indices = @transform_9, window_bounds = array<i64: 1, 16>}, {pipeline_mode = #tpu.pipeline_mode<synchronous>, transform_indices = @transform_10, window_bounds = array<i64: 16, 256>}, {transform_indices = @transform_11, window_bounds = array<i64: 16, 256>}]} {
    %c0 = arith.constant 0 : index
    %c0_0 = arith.constant 0 : index
    %0 = vector.load %arg1[%c0, %c0_0] : memref<16x3xf32, #tpu.memory_space<vmem>>, vector<16x3xf32>
    %c0_1 = arith.constant 0 : index
    %c0_2 = arith.constant 0 : index
    %1 = vector.load %arg5[%c0_1, %c0_2] : memref<3x16xf32, #tpu.memory_space<vmem>>, vector<3x16xf32>
    %cst = arith.constant dense<0.000000e+00> : vector<16x16xf32>
    %2 = tpu.matmul %0, %1, %cst {dimension_numbers = #tpu.dot_dimension_numbers<[1], [0], [0], [1], [0, 0, 1, 1], [], []>} : vector<16x3xf32>, vector<3x16xf32>, vector<16x16xf32> -> vector<16x16xf32>
    %c0_3 = arith.constant 0 : index
    %c0_4 = arith.constant 0 : index
    %3 = vector.load %arg6[%c0_3, %c0_4] : memref<1x16xf32, #tpu.memory_space<vmem>>, vector<1x16xf32>
    %4 = vector.broadcast %3 : vector<1x16xf32> to vector<16x16xf32>
    %5 = arith.addf %2, %4 : vector<16x16xf32>
    %c0_5 = arith.constant 0 : index
    %c0_6 = arith.constant 0 : index
    %6 = vector.load %arg3[%c0_5, %c0_6] : memref<1x16xf32, #tpu.memory_space<vmem>>, vector<1x16xf32>
    %7 = vector.broadcast %6 : vector<1x16xf32> to vector<16x16xf32>
    %8 = arith.mulf %7, %5 : vector<16x16xf32>
    %9 = math.sin %8 : vector<16x16xf32>
    %c0_7 = arith.constant 0 : index
    %c0_8 = arith.constant 0 : index
    %10 = vector.load %arg7[%c0_7, %c0_8] : memref<16x16xf32, #tpu.memory_space<vmem>>, vector<16x16xf32>
    %cst_9 = arith.constant dense<0.000000e+00> : vector<16x16xf32>
    %11 = tpu.matmul %9, %10, %cst_9 {dimension_numbers = #tpu.dot_dimension_numbers<[1], [0], [0], [1], [0, 0, 1, 1], [], []>} : vector<16x16xf32>, vector<16x16xf32>, vector<16x16xf32> -> vector<16x16xf32>
    %c0_10 = arith.constant 0 : index
    %c0_11 = arith.constant 0 : index
    %12 = vector.load %arg8[%c0_10, %c0_11] : memref<1x16xf32, #tpu.memory_space<vmem>>, vector<1x16xf32>
    %13 = vector.broadcast %12 : vector<1x16xf32> to vector<16x16xf32>
    %14 = arith.addf %11, %13 : vector<16x16xf32>
    %c0_12 = arith.constant 0 : index
    %c0_13 = arith.constant 0 : index
    %15 = vector.load %arg3[%c0_12, %c0_13] : memref<1x16xf32, #tpu.memory_space<vmem>>, vector<1x16xf32>
    %16 = vector.broadcast %15 : vector<1x16xf32> to vector<16x16xf32>
    %17 = arith.mulf %16, %14 : vector<16x16xf32>
    %18 = math.sin %17 : vector<16x16xf32>
    %c0_14 = arith.constant 0 : index
    %c0_15 = arith.constant 0 : index
    %19 = vector.load %arg9[%c0_14, %c0_15] : memref<16x16xf32, #tpu.memory_space<vmem>>, vector<16x16xf32>
    %cst_16 = arith.constant dense<0.000000e+00> : vector<16x16xf32>
    %20 = tpu.matmul %18, %19, %cst_16 {dimension_numbers = #tpu.dot_dimension_numbers<[1], [0], [0], [1], [0, 0, 1, 1], [], []>} : vector<16x16xf32>, vector<16x16xf32>, vector<16x16xf32> -> vector<16x16xf32>
    %c0_17 = arith.constant 0 : index
    %c0_18 = arith.constant 0 : index
    %21 = vector.load %arg10[%c0_17, %c0_18] : memref<1x16xf32, #tpu.memory_space<vmem>>, vector<1x16xf32>
    %22 = vector.broadcast %21 : vector<1x16xf32> to vector<16x16xf32>
    %23 = arith.addf %20, %22 : vector<16x16xf32>
    %c0_19 = arith.constant 0 : index
    %c0_20 = arith.constant 0 : index
    %24 = vector.load %arg3[%c0_19, %c0_20] : memref<1x16xf32, #tpu.memory_space<vmem>>, vector<1x16xf32>
    %25 = vector.broadcast %24 : vector<1x16xf32> to vector<16x16xf32>
    %26 = arith.mulf %25, %23 : vector<16x16xf32>
    %27 = math.sin %26 : vector<16x16xf32>
    %c0_21 = arith.constant 0 : index
    %c0_22 = arith.constant 0 : index
    %28 = vector.load %arg11[%c0_21, %c0_22] : memref<16x256xf32, #tpu.memory_space<vmem>>, vector<16x256xf32>
    %cst_23 = arith.constant dense<0.000000e+00> : vector<16x256xf32>
    %29 = tpu.matmul %27, %28, %cst_23 {dimension_numbers = #tpu.dot_dimension_numbers<[1], [0], [0], [1], [0, 0, 1, 1], [], []>} : vector<16x16xf32>, vector<16x256xf32>, vector<16x256xf32> -> vector<16x256xf32>
    %c0_24 = arith.constant 0 : index
    %c0_25 = arith.constant 0 : index
    %30 = vector.load %arg2[%c0_24, %c0_25] : memref<16x1xf32, #tpu.memory_space<vmem>>, vector<16x1xf32>
    %cst_26 = arith.constant 0.000000e+00 : f32
    %31 = vector.broadcast %cst_26 : f32 to vector<16x1xf32>
    %32 = arith.subf %31, %30 : vector<16x1xf32>
    %c0_27 = arith.constant 0 : index
    %c0_28 = arith.constant 0 : index
    %33 = vector.load %arg4[%c0_27, %c0_28] : memref<1x256xf32, #tpu.memory_space<vmem>>, vector<1x256xf32>
    %34 = vector.broadcast %32 : vector<16x1xf32> to vector<16x256xf32>
    %35 = vector.broadcast %33 : vector<1x256xf32> to vector<16x256xf32>
    %36 = arith.mulf %34, %35 : vector<16x256xf32>
    %37 = math.exp %36 : vector<16x256xf32>
    %cst_29 = arith.constant 5.000000e-02 : f32
    %38 = vector.broadcast %cst_29 : f32 to vector<16x256xf32>
    %39 = arith.addf %37, %38 : vector<16x256xf32>
    %40 = arith.mulf %29, %39 : vector<16x256xf32>
    %c0_30 = arith.constant 0 : index
    %c0_31 = arith.constant 0 : index
    %41 = vector.load %arg12[%c0_30, %c0_31] : memref<16x256xf32, #tpu.memory_space<vmem>>, vector<16x256xf32>
    tpu.vector_store %arg12[%c0_30, %c0_31], %40 {strides = array<i32>} : memref<16x256xf32, #tpu.memory_space<vmem>>, vector<16x256xf32>,
    return
  }
  func.func @transform_0(%arg0: i32) -> (i32, i32) {
    %c0_i32 = arith.constant 0 : i32
    %c0_i32_0 = arith.constant 0 : i32
    return %arg0, %c0_i32 : i32, i32
  }
  func.func @transform_1(%arg0: i32) -> (i32, i32) {
    %c0_i32 = arith.constant 0 : i32
    %c0_i32_0 = arith.constant 0 : i32
    return %arg0, %c0_i32 : i32, i32
  }
  func.func @transform_2(%arg0: i32) -> (i32, i32) {
    %c0_i32 = arith.constant 0 : i32
    %c0_i32_0 = arith.constant 0 : i32
    %c0_i32_1 = arith.constant 0 : i32
    return %c0_i32, %c0_i32_0 : i32, i32
  }
  func.func @transform_3(%arg0: i32) -> (i32, i32) {
    %c0_i32 = arith.constant 0 : i32
    %c0_i32_0 = arith.constant 0 : i32
    %c0_i32_1 = arith.constant 0 : i32
    return %c0_i32, %c0_i32_0 : i32, i32
  }
  func.func @transform_4(%arg0: i32) -> (i32, i32) {
    %c0_i32 = arith.constant 0 : i32
    %c0_i32_0 = arith.constant 0 : i32
    %c0_i32_1 = arith.constant 0 : i32
    return %c0_i32, %c0_i32_0 : i32, i32
  }
  func.func @transform_5(%arg0: i32) -> (i32, i32) {
    %c0_i32 = arith.constant 0 : i32
    %c0_i32_0 = arith.constant 0 : i32
    %c0_i32_1 = arith.constant 0 : i32
    return %c0_i32, %c0_i32_0 : i32, i32
  }
  func.func @transform_6(%arg0: i32) -> (i32, i32) {
    %c0_i32 = arith.constant 0 : i32
    %c0_i32_0 = arith.constant 0 : i32
    %c0_i32_1 = arith.constant 0 : i32
    return %c0_i32, %c0_i32_0 : i32, i32
  }
  func.func @transform_7(%arg0: i32) -> (i32, i32) {
    %c0_i32 = arith.constant 0 : i32
    %c0_i32_0 = arith.constant 0 : i32
    %c0_i32_1 = arith.constant 0 : i32
    return %c0_i32, %c0_i32_0 : i32, i32
  }
  func.func @transform_8(%arg0: i32) -> (i32, i32) {
    %c0_i32 = arith.constant 0 : i32
    %c0_i32_0 = arith.constant 0 : i32
    %c0_i32_1 = arith.constant 0 : i32
    return %c0_i32, %c0_i32_0 : i32, i32
  }
  func.func @transform_9(%arg0: i32) -> (i32, i32) {
    %c0_i32 = arith.constant 0 : i32
    %c0_i32_0 = arith.constant 0 : i32
    %c0_i32_1 = arith.constant 0 : i32
    return %c0_i32, %c0_i32_0 : i32, i32
  }
  func.func @transform_10(%arg0: i32) -> (i32, i32) {
    %c0_i32 = arith.constant 0 : i32
    %c0_i32_0 = arith.constant 0 : i32
    %c0_i32_1 = arith.constant 0 : i32
    return %c0_i32, %c0_i32_0 : i32, i32
  }
  func.func @transform_11(%arg0: i32) -> (i32, i32) {
    %c0_i32 = arith.constant 0 : i32
    %c0_i32_0 = arith.constant 0 : i32
    return %arg0, %c0_i32 : i32, i32
  }
}

</mosaic_0001>

<bundles_post_ra>
// kernel: tpu_custom_call.1
= control target key start
LH: loop header
LB: loop body
LE: loop exit
PB: predicated region body
PF: predicated region fallthrough
CT: control target
= control target key end

     0   :  { %s2348_s0 = inlined_call_operand.vmem [shape: f32[64,3], index: 0, kind: input, shape index: {}]   ;;  %s2349_s1 = inlined_call_operand.vmem [shape: f32[64,1], index: 1, kind: input, shape index: {}]   ;;  %s2350_s2 = inlined_call_operand.vmem [shape: f32[1,16], index: 2, kind: input, shape index: {}]   ;;  %s2351_s3 = inlined_call_operand.vmem [shape: f32[1,256], index: 3, kind: input, shape index: {}]   ;;  %s2352_s4 = inlined_call_operand.vmem [shape: f32[3,16], index: 4, kind: input, shape index: {}]   ;;  %s2353_s5 = inlined_call_operand.vmem [shape: f32[1,16], index: 5, kind: input, shape index: {}]   ;;  %s2354_s6 = inlined_call_operand.vmem [shape: f32[16,16], index: 6, kind: input, shape index: {}]   ;;  %s2355_s7 = inlined_call_operand.vmem [shape: f32[1,16], index: 7, kind: input, shape index: {}]   ;;  %s2356_s8 = inlined_call_operand.vmem [shape: f32[16,16], index: 8, kind: input, shape index: {}]   ;;  %s2357_s9 = inlined_call_operand.vmem [shape: f32[1,16], index: 9, kind: input, shape index: {}]   ;;  %s2358_s10 = inlined_call_operand.vmem [shape: f32[16,256], index: 10, kind: input, shape index: {}]   ;;  %s2359_s11 = inlined_call_operand.hbm [shape: f32[64,256], index: 11, kind: output, shape index: {}]  }
   0x1   :  { %2360 = sst [smem:[#allocation5_spill]] %s2352_s4 }
   0x2   :  { %16 = vsyncpa [#allocation3], 0 }
   0x3   :  { %18 = vsyncpa [#allocation3 + $0x1], 0  ;;  %s1887_s17 = smov 0   ;;  %s1889_s18 = smov 0  }
   0x4   :  { %s1891_s19 = smov 0   ;;  %s1893_s20 = smov 0  }
   0x5 LB: > { %s1908_s21 = sadd.s32 4294967295, %s1814_s20   ;;  %s1550_s22 = sadd.s32 4294967294, %s1814_s20   ;;  %s1814_s20 = sphi %s1893_s20, %s2367_s20   ;;  %s1810_s19 = sphi %s1891_s19, %s2366_s19   ;;  %s1806_s18 = sphi %s1889_s18, %s2365_s18   ;;  %s1802_s17 = sphi %s1887_s17, %s2364_s17  }
   0x6   : > { %s1912_s23 = sadd.s32 1, %s1814_s20   ;;  %s272_s24 = sadd.s32 1, %s1810_s19 }
   0x7   : > { %s269_s25 = ssub.s32 %s1814_s20, %s1912_s23  ;;  %p282_p0 = scmp.ne.s32.totalorder %s1810_s19, %s1806_s18 }
   0x8   : > { %p270_p1 = scmp.eq.s32.totalorder %s269_s25, 0  ;;  %p283_p2 = scmp.eq.s32.totalorder %s1908_s21, 3 }
   0x9   : > { %p288_p3 = scmp.ne.s32.totalorder %s1806_s18, %s1802_s17  ;;  %p289_p4 = scmp.eq.s32.totalorder %s1550_s22, 3 }
   0xa   : > { %s1923_s26 = scalar_select %p270_p1, %s1810_s19, %s272_s24  }
   0xb   : > { %p1925_p5 = por %p283_p2, %p282_p0  ;;  %p1929_p6 = por %p289_p4, %p288_p3 }
   0xc   : > { %p1553_p7 = scmp.ge.s32.totalorder %s1814_s20, 1  ;;  %p352_p8 = scmp.lt.s32.totalorder %s1814_s20, 5 }
   0xe   : > { %p353_p9 = pnand %p1553_p7, %p352_p8 }
   0xf   : > { %s2363_s4 = sld [smem:[#allocation5_spill]] (!%p353_p9)  ;;  %vm427_vm0 = vcmask (!%p353_p9), 1042432   ;;  %s1555_s12 = sshll.u32 (!%p353_p9), %s1908_s21, 1  ;;  %vm420_vm1 = vcmask (!%p353_p9), 23552   ;;  %v723_v3 = vld [vmem:[%s2354_s6] sm:$0xff] (!%p353_p9)  ;;  %v724_v4 = vld [vmem:[%s2354_s6 + $0x8] sm:$0xff] (!%p353_p9) }
  0x10   : > { %356 = sbr.rel (%p353_p9) target bundleno = 1175 (0x497), region = 64  ;;  %p398_p10 = scmp.lt.s32.totalorder (!%p353_p9), %s1555_s12, 7  ;;  %v1634_v5 = vpack.c.bf16 (!%p353_p9), %v724_v4, %v723_v3  ;;  %v1559_v6 = vld [vmem:[%s2353_s5] ss:$0 sm:$0xff] (!%p353_p9)  ;;  %v1816_v34 = vmov (!%p353_p9), 683565275  }
  0x11   : > { %v1959_v8 = vld [vmem:[%s2350_s2] ss:$0 sm:$0xff] (!%p353_p9)  ;;  %v1817_v36 = vmov (!%p353_p9), 2475754826   ;;  %v1818_v39 = vmov (!%p353_p9), 2131351028  }
  0x12   : > { %v1819_v41 = vmov (!%p353_p9), 2102212464   ;;  %v1820_v43 = vmov (!%p353_p9), 920167782   ;;  %v1821_v50 = vmov (!%p353_p9), 1326507024  }
  0x13   : > { %s1603_s29 = sshll.u32 (!%p353_p9), %s1908_s21, 9 }
  0x14   : > { %s2305_s15 = scalar_lea.hbm (!%p353_p9), %s2359_s11, %s1603_s29 }
  0x15   : > { %v412_v0 = vld [vmem:[%s2363_s4] sm:$0x7] (!%p353_p9) }
  0x16   : > { %1615 = vmatprep.subr.msk.mxu0 (!%p353_p9), %vm427_vm0, %v412_v0 }
  0x17   : > { %1616 = vmatpush3.msk.msra.mxu0 %vm427_vm0, %v412_v0  ;;  %s2369_s12 = smov (!%p398_p10, %s1555_s12), 7 }
  0x18   : > { %s1556_s13 = sshll.u32 %s2369_s12, 3  ;;  %1635 = vmatprep.subr.bf16.mxu0 %v1634_v5  ;;  %s1824_s12 = smov [#allocation2]  }
  0x19   : > { %s401_s16 = scalar_lea.vmem %s2348_s0, %s1556_s13  ;;  %s407_s14 = scalar_lea.vmem %s2349_s1, %s1556_s13 }
  0x1a   : > { %v410_v1 = vld [vmem:[%s401_s16] sm:$0xff]  ;;  %v411_v2 = vld [vmem:[%s401_s16 + $0x8] sm:$0xff]  ;;  %s394_s16 = sand.u32 1, %s1806_s18   ;;  %s1756_s13 = sshll.u32 %s1824_s12, 4  ;;  %s1757_s13 = int_to_ptr.vmem [resolvable:$false] %s1756_s13 }
  0x1b   : > { %1617 = vmatprep.mubr.msk.f32.mxu0 %vm420_vm1, %v410_v1  ;;  %s1554_s22 = sshll.u32 %s394_s16, 5  ;;  %s2307_s4 = scalar_lea.sflag [#allocation3], %s394_s16 }
  0x1c   : > { %1618 = vmatmul.mubr.msk.f32.vlgmr.msra.gmra.mrb[0].mxu0 %vm420_vm1, %v411_v2  ;;  %s396_s24 = scalar_lea.vmem [#allocation2], %s1554_s22  ;;  %s1758_s22 = scalar_lea.vmem %s1757_s13, 1024 }
  0x1d   : > { %1637 = vmatpush3.bf16.msra.mxu0 %v1634_v5  ;;  %s1476_s25 = sshll.u32 %s396_s24, 4  ;;  %s2300_s25 = int_to_ptr.vmem [resolvable:$true] %s1476_s25 }
  0x1e   : > { %s1752_s21 = scalar_lea.vmem %s2300_s25, 512  ;;  %p1759_p0 = scmp.lt.s32.totalorder %s2300_s25, %s1757_s13 }
  0x1f   : > { %p1753_p11 = scmp.ne.s32.totalorder %s2300_s25, %s1752_s21  ;;  %p1760_p1 = scmp.lt.s32.totalorder %s1758_s22, %s1752_s21 }
  0x21   : > { %p1754_p12 = pnand %p1753_p11, %p1925_p5  ;;  %p1761_p2 = por %p1760_p1, %p1759_p0 }
  0x23   : > { %p1755_p13 = pneg %p1754_p12 }
  0x25   : > { %p1762_p3 = pnand %p1761_p2, %p1755_p13 }
  0xef   : > { %v1619_v7 = vpop.f32.mrb[0].mxu0 }
  0xf0   : > { %v503_v9 = vadd.f32 %v1619_v7, %v1559_v6  ;;  %v497_v10 = vpop.f32.mrb[1].mxu0 }
  0xf1   : > { %v498_v11 = vadd.f32 %v1559_v6, %v497_v10 }
  0xf2   : > { %v1962_v12 = vmul.f32 %v1959_v8, %v503_v9 }
  0xf3   : > { %v1965_v13 = vmul.f32 %v1959_v8, %v498_v11 }
  0xf4   : > { %v619_v14 = vand.u32 2147483647, %v1962_v12  ;;  %v622_v15 = vand.u32 2139095040, %v1962_v12  ;;  %vm621_vm1 = vcmp.lt.s32.totalorder %v1962_v12, 0 }
  0xf5   : > { %v518_v16 = vand.u32 2139095040, %v1965_v13  ;;  %v515_v25 = vand.u32 2147483647, %v1965_v13 }
  0xf6   : > { %v623_v17 = vshrl.u32 %v622_v15, 23  ;;  %v626_v18 = vand.u32 8388607, %v619_v14  ;;  %vm620_vm0 = vcmp.le.f32.partialorder %v619_v14, 0.7853982 }
  0xf7   : > { %v519_v19 = vshrl.u32 %v518_v16, 23  ;;  %v1979_v32 = vand.u32 8388607, %v515_v25 }
  0xf8   : > { %v1568_v20 = vadd.s32 4294967169, %v623_v17  ;;  %v627_v23 = vor.u32 8388608, %v626_v18 }
  0xf9   : > { %v1564_v21 = vadd.s32 4294967169, %v519_v19 }
  0xfa   : > { %v629_v22 = vadd.s32 1, %v1568_v20  ;;  %v1973_v30 = vshll.u32 %v627_v23, 8 }
  0xfb   : > { %v525_v24 = vadd.s32 1, %v1564_v21  ;;  %v523_v21 = vor.u32 8388608, %v1979_v32 }
  0xfc   : > { %vm630_vm2 = vcmp.gt.s32.totalorder %v629_v22, 0 }
  0xfd   : > { %v631_v26 = vsel %vm630_vm2, %v629_v22, 0  ;;  %vm526_vm3 = vcmp.gt.s32.totalorder %v525_v24, 0  ;;  %vm517_vm2 = vcmp.lt.s32.totalorder %v1965_v13, 0 }
  0xfe   : > { %v632_v27 = vshrl.u32 %v631_v26, 5  ;;  %v633_v28 = vand.u32 31, %v631_v26  ;;  %v527_v29 = vsel %vm526_vm3, %v525_v24, 0  ;;  %vm516_vm3 = vcmp.le.f32.partialorder %v515_v25, 0.7853982 }
  0xff   : > { %v1975_v31 = vshrl.u32 %v527_v29, 5  ;;  %v529_v38 = vand.u32 31, %v527_v29 }
 0x100   : > { %v634_v33 = vsub.s32 32, %v633_v28  ;;  %v636_v35 = vshll.u32 %v1816_v34, %v633_v28  ;;  %v639_v37 = vshll.u32 %v1817_v36, %v633_v28  ;;  %v642_v40 = vshll.u32 %v1818_v39, %v633_v28 }
 0x101   : > { %v645_v42 = vshll.u32 %v1819_v41, %v633_v28  ;;  %v648_v44 = vshll.u32 %v1820_v43, %v633_v28  ;;  %vm651_vm4 = vcmp.lt.s32.totalorder %v632_v27, 1  ;;  %vm652_vm5 = vcmp.lt.s32.totalorder %v632_v27, 2 }
 0x102   : > { %v637_v45 = vshrl.u32 %v1817_v36, %v634_v33  ;;  %v640_v46 = vshrl.u32 %v1818_v39, %v634_v33  ;;  %v643_v47 = vshrl.u32 %v1819_v41, %v634_v33  ;;  %v635_v48 = vshrl.u32 %v1816_v34, %v634_v33 }
 0x103   : > { %v646_v49 = vshrl.u32 %v1820_v43, %v634_v33  ;;  %v649_v51 = vshrl.u32 %v1821_v50, %v634_v33  ;;  %vm653_vm6 = vcmp.lt.s32.totalorder %v632_v27, 3  ;;  %v530_v55 = vsub.s32 32, %v529_v38 }
 0x104   : > { %v638_v52 = vor.u32 %v637_v45, %v636_v35  ;;  %v641_v53 = vor.u32 %v640_v46, %v639_v37  ;;  %v644_v54 = vor.u32 %v643_v47, %v642_v40  ;;  %vm654_vm7 = vcmp.lt.s32.totalorder %v632_v27, 4 }
 0x105   : > { %v647_v56 = vor.u32 %v646_v49, %v645_v42  ;;  %v650_v57 = vor.u32 %v649_v51, %v648_v44  ;;  %v541_v58 = vshll.u32 %v1819_v41, %v529_v38  ;;  %v542_v2 = vshrl.u32 %v1820_v43, %v530_v55 }
 0x106   : > { %v655_v59 = vsel %vm651_vm4, %v635_v48, %v638_v52  ;;  %v656_v60 = vsel %vm654_vm7, %v644_v54, 2102212464  ;;  %v659_v61 = vsel %vm651_vm4, %v638_v52, %v641_v53  ;;  %v663_v62 = vsel %vm651_vm4, %v641_v53, %v644_v54 }
 0x107   : > { %v657_v63 = vsel %vm653_vm6, %v641_v53, %v656_v60  ;;  %v660_v0 = vsel %vm654_vm7, %v647_v56, 920167782  ;;  %v664_v1 = vsel %vm654_vm7, %v650_v57, 1326507024  ;;  %v545_v6 = vshrl.u32 %v1821_v50, %v530_v55 }
 0x108   : > { %v658_v3 = vsel %vm652_vm5, %v655_v59, %v657_v63  ;;  %v661_v4 = vsel %vm653_vm6, %v644_v54, %v660_v0  ;;  %v665_v5 = vsel %vm653_vm6, %v647_v56, %v664_v1  ;;  %v543_v10 = vor.u32 %v542_v2, %v541_v58 }
 0x109   : > { %v662_v7 = vsel %vm652_vm5, %v659_v61, %v661_v4  ;;  %v666_v9 = vsel %vm652_vm5, %v663_v62, %v665_v5  ;;  %v544_v11 = vshll.u32 %v1820_v43, %v529_v38  ;;  %v674_v19 = vmul.u32 %v1973_v30, %v658_v3 }
 0x10a   : > { %v2006_v15 = vmul.u32.u64.low %v1973_v30, %v666_v9  ;;  %v2007_v16 = vmul.u32.u64.high %v1973_v30, %v666_v9, %v2006_v15  ;;  %v2010_v17 = vmul.u32.u64.low %v1973_v30, %v662_v7  ;;  %v2011_v18 = vmul.u32.u64.high %v1973_v30, %v662_v7, %v2010_v17 }
 0x10b   : > { %v546_v20 = vor.u32 %v545_v6, %v544_v11  ;;  %vm550_vm8 = vcmp.lt.s32.totalorder %v1975_v31, 4  ;;  %v532_v22 = vshll.u32 %v1816_v34, %v529_v38  ;;  %v533_v23 = vshrl.u32 %v1817_v36, %v530_v55 }
 0x10c   : > { %v536_v24 = vshrl.u32 %v1818_v39, %v530_v55  ;;  %v535_v27 = vshll.u32 %v1817_v36, %v529_v38  ;;  %v538_v28 = vshll.u32 %v1818_v39, %v529_v38  ;;  %v539_v29 = vshrl.u32 %v1819_v41, %v530_v55 }
 0x10d   : > { %v560_v26 = vsel %vm550_vm8, %v546_v20, 1326507024  ;;  %vm676_vm9 = vc.u32 %v2007_v16, %v2010_v17  ;;  %v677_v30 = vadd.s32 1, %v2011_v18  ;;  %v556_v32 = vsel %vm550_vm8, %v543_v10, 920167782 }
 0x10e   : > { %v534_v33 = vor.u32 %v533_v23, %v532_v22  ;;  %v531_v35 = vshrl.u32 %v1816_v34, %v530_v55  ;;  %v537_v37 = vor.u32 %v536_v24, %v535_v27  ;;  %v540_v40 = vor.u32 %v539_v29, %v538_v28 }
 0x10f   : > { %vm549_vm10 = vcmp.lt.s32.totalorder %v1975_v31, 3  ;;  %v678_v42 = vsel %vm676_vm9, %v677_v30, %v2011_v18  ;;  %vm547_vm11 = vcmp.lt.s32.totalorder %v1975_v31, 1  ;;  %vm548_vm12 = vcmp.lt.s32.totalorder %v1975_v31, 2 }
 0x110   : > { %v561_v38 = vsel %vm549_vm10, %v543_v10, %v560_v26  ;;  %v679_v44 = vadd.s32 %v678_v42, %v674_v19  ;;  %v552_v45 = vsel %vm550_vm8, %v540_v40, 2102212464  ;;  %v555_v46 = vsel %vm547_vm11, %v534_v33, %v537_v37 }
 0x111   : > { %v557_v47 = vsel %vm549_vm10, %v540_v40, %v556_v32  ;;  %v559_v49 = vsel %vm547_vm11, %v537_v37, %v540_v40  ;;  %v563_v51 = vshll.u32 %v523_v21, 8  ;;  %v551_v53 = vsel %vm547_vm11, %v531_v35, %v534_v33 }
 0x112   : > { %v558_v48 = vsel %vm548_vm12, %v555_v46, %v557_v47  ;;  %v680_v52 = vadd.s32 536870912, %v679_v44  ;;  %v553_v54 = vsel %vm549_vm10, %v537_v37, %v552_v45  ;;  %v562_v55 = vsel %vm548_vm12, %v559_v49, %v561_v38 }
 0x113   : > { %v2039_v56 = vmul.u32.u64.low %v563_v51, %v562_v55  ;;  %v2040_v57 = vmul.u32.u64.high %v563_v51, %v562_v55, %v2039_v56  ;;  %v2042_v58 = vmul.u32.u64.low %v563_v51, %v558_v48  ;;  %v2043_v59 = vmul.u32.u64.high %v563_v51, %v558_v48, %v2042_v58 }
 0x114   : > { %v681_v60 = vshrl.u32 %v680_v52, 30  ;;  %v554_v61 = vsel %vm548_vm12, %v551_v53, %v553_v54  ;;  %v675_v18 = vadd.s32 %v2010_v17, %v2007_v16  ;;  %vm711_vm7 = vweird.f32 %v1962_v12 }
 0x115   : > { %vm572_vm13 = vc.u32 %v2040_v57, %v2042_v58  ;;  %v573_v63 = vadd.s32 1, %v2043_v59  ;;  %v570_v1 = vmul.u32 %v563_v51, %v554_v61  ;;  %v571_v16 = vadd.s32 %v2042_v58, %v2040_v57 }
 0x116   : > { %v682_v62 = vshll.u32 %v681_v60, 30  ;;  %v705_v40 = vsub.s32 4, %v681_v60  ;;  %vm732_vm11 = vcmask 130048   ;;  %vm607_vm12 = vweird.f32 %v1965_v13 }
 0x117   : > { %v574_v2 = vsel %vm572_vm13, %v573_v63, %v2043_v59 }
 0x118   : > { %v683_v0 = vsub.s32 %v679_v44, %v682_v62  ;;  %v575_v4 = vadd.s32 %v574_v2, %v570_v1  ;;  %v706_v52 = vsel %vm621_vm1, %v705_v40, %v681_v60 }
 0x119   : > { %v708_v55 = vsel %vm620_vm0, 0, %v706_v52 }
 0x11a   : > { %v685_v3 = vsub.s32 0, %v683_v0  ;;  %v576_v6 = vadd.s32 536870912, %v575_v4  ;;  %v712_v61 = vadd.s32 3, %v708_v55 }
 0x11c   : > { %v1569_v5 = vmin.u32 %v685_v3, %v683_v0  ;;  %v577_v9 = vshrl.u32 %v576_v6, 30  ;;  %v713_v60 = vand.u32 3, %v712_v61 }
 0x11e   : > { %v687_v7 = vclz %v1569_v5  ;;  %v578_v11 = vshll.u32 %v577_v9, 30  ;;  %v601_v59 = vsub.s32 4, %v577_v9  ;;  %vm718_vm4 = vcmp.eq.s32.totalorder %v713_v60, 2 }
 0x11f   : > { %vm715_vm5 = vcmp.eq.s32.totalorder %v713_v60, 0  ;;  %vm714_vm6 = vcmp.lt.s32.totalorder %v713_v60, 2 }
 0x120   : > { %v1570_v10 = vadd.s32 4294967294, %v687_v7  ;;  %v579_v31 = vsub.s32 %v575_v4, %v578_v11  ;;  %v602_v63 = vsel %vm517_vm2, %v601_v59, %v577_v9 }
 0x121   : > { %v604_v3 = vsel %vm516_vm3, 0, %v602_v63 }
 0x122   : > { %vm1571_vm14 = vcmp.lt.s32.totalorder %v1570_v10, 0  ;;  %v581_v21 = vsub.s32 0, %v579_v31  ;;  %v608_v7 = vadd.s32 3, %v604_v3 }
 0x123   : > { %v690_v15 = vsel %vm1571_vm14, 0, %v1570_v10 }
 0x124   : > { %v691_v19 = vsub.s32 32, %v690_v15  ;;  %v695_v20 = vsub.s32 4294967266, %v690_v15  ;;  %v692_v22 = vshll.u32 %v683_v0, %v690_v15  ;;  %v1565_v26 = vmin.u32 %v581_v21, %v579_v31 }
 0x125   : > { %v609_v11 = vand.u32 3, %v608_v7 }
 0x126   : > { %v693_v23 = vshrl.u32 %v675_v18, %v691_v19  ;;  %v696_v24 = vadd.s32 127, %v695_v20  ;;  %v583_v29 = vclz %v1565_v26 }
 0x127   : > { %vm614_vm8 = vcmp.eq.s32.totalorder %v609_v11, 2  ;;  %vm611_vm9 = vcmp.eq.s32.totalorder %v609_v11, 0  ;;  %vm610_vm10 = vcmp.lt.s32.totalorder %v609_v11, 2 }
 0x128   : > { %v694_v27 = vor.u32 %v693_v23, %v692_v22  ;;  %v697_v28 = vshll.u32 %v696_v24, 23  ;;  %v1566_v32 = vadd.s32 4294967294, %v583_v29  ;;  %v1025_v24 = vld [vmem:[%s2356_s8 + $0x8] sm:$0xff] }
 0x12a   : > { %v698_v30 = vor.u32 4788187, %v697_v28  ;;  %v701_v35 = vcvt.s32.f32 %v694_v27  ;;  %vm1567_vm15 = vcmp.lt.s32.totalorder %v1566_v32, 0 }
 0x12b   : > { %v586_v37 = vsel %vm1567_vm15, 0, %v1566_v32 }
 0x12c   : > { %v699_v33 = vand.u32 2147483647, %v698_v30  ;;  %v587_v17 = vsub.s32 32, %v586_v37  ;;  %v591_v38 = vsub.s32 4294967266, %v586_v37  ;;  %v588_v45 = vshll.u32 %v579_v31, %v586_v37 }
 0x12e   : > { %v702_v42 = vmul.f32 %v701_v35, %v699_v33  ;;  %v589_v46 = vshrl.u32 %v571_v16, %v587_v17  ;;  %v592_v47 = vadd.s32 127, %v591_v38 }
 0x130   : > { %v703_v44 = vxor.u32 2147483648, %v702_v42  ;;  %v590_v49 = vor.u32 %v589_v46, %v588_v45  ;;  %v593_v51 = vshll.u32 %v592_v47, 23 }
 0x132   : > { %v704_v48 = vsel %vm621_vm1, %v703_v44, %v702_v42  ;;  %v594_v54 = vor.u32 4788187, %v593_v51  ;;  %v597_v57 = vcvt.s32.f32 %v590_v49 }
 0x133   : > { %v707_v53 = vsel %vm620_vm0, %v1962_v12, %v704_v48  ;;  %v1024_v12 = vld [vmem:[%s2356_s8] sm:$0xff] }
 0x134   : > { %1720 = vcosq.f32 %v707_v53  ;;  %v595_v56 = vand.u32 2147483647, %v594_v54  ;;  %v1638_v26 = vpack.c.bf16 %v1025_v24, %v1024_v12 }
 0x135   : > { %1722 = vsinq.f32 %v707_v53 }
 0x136   : > { %v598_v58 = vmul.f32 %v597_v57, %v595_v56  ;;  %1639 = vmatprep.subr.bf16.mxu0 %v1638_v26 }
 0x138   : > { %v599_v62 = vxor.u32 2147483648, %v598_v58 }
 0x13a   : > { %v600_v14 = vsel %vm517_vm2, %v599_v62, %v598_v58 }
 0x13b   : > { %v603_v0 = vsel %vm516_vm3, %v1965_v13, %v600_v14  ;;  %v1572_v13 = vld [vmem:[%s2355_s7] ss:$0 sm:$0xff] }
 0x13c   : > { %1724 = vcosq.f32 %v603_v0 }
 0x13d   : > { %1726 = vsinq.f32 %v603_v0 }
 0x13e   : > { %v1721_v1 = vpop.eup %1720 }
 0x13f   : > { %v1723_v2 = vpop.eup %1722  ;;  %v719_v4 = vxor.u32 2147483648, %v1721_v1 }
 0x140   : > { %v716_v5 = vxor.u32 2147483648, %v1723_v2 }
 0x141   : > { %v720_v6 = vsel %vm718_vm4, %v719_v4, %v1723_v2 }
 0x142   : > { %v717_v10 = vsel %vm715_vm5, %v1721_v1, %v716_v5 }
 0x143   : > { %v721_v25 = vsel %vm714_vm6, %v717_v10, %v720_v6 }
 0x144   : > { %v722_v9 = vsel %vm711_vm7, nan, %v721_v25 }
 0x146   : > { %v1725_v31 = vpop.eup %1724 }
 0x147   : > { %v1727_v15 = vpop.eup %1726  ;;  %v615_v18 = vxor.u32 2147483648, %v1725_v31 }
 0x148   : > { %v612_v19 = vxor.u32 2147483648, %v1727_v15 }
 0x149   : > { %v616_v20 = vsel %vm614_vm8, %v615_v18, %v1727_v15 }
 0x14a   : > { %v613_v21 = vsel %vm611_vm9, %v1725_v31, %v612_v19 }
 0x14b   : > { %v617_v22 = vsel %vm610_vm10, %v613_v21, %v616_v20 }
 0x14c   : > { %v618_v23 = vsel %vm607_vm12, nan, %v617_v22 }
 0x14d   : > { %1624 = vmatprep.mubr.msk.f32.mxu0 %vm732_vm11, %v618_v23 }
 0x14e   : > { %1625 = vmatmul.mubr.msk.f32.vlgmr.msra.gmra.mrb[2].mxu0 %vm732_vm11, %v722_v9 }
 0x14f   : > { %1641 = vmatpush3.bf16.msra.mxu0 %v1638_v26 }
 0x221   : > { %v1626_v27 = vpop.f32.mrb[2].mxu0 }
 0x222   : > { %v811_v28 = vadd.f32 %v1626_v27, %v1572_v13  ;;  %v805_v29 = vpop.f32.mrb[3].mxu0 }
 0x223   : > { %v806_v30 = vadd.f32 %v1572_v13, %v805_v29 }
 0x224   : > { %v2074_v32 = vmul.f32 %v1959_v8, %v811_v28 }
 0x225   : > { %v2077_v33 = vmul.f32 %v1959_v8, %v806_v30 }
 0x226   : > { %v920_v35 = vand.u32 2147483647, %v2074_v32  ;;  %v923_v37 = vand.u32 2139095040, %v2074_v32 }
 0x227   : > { %v819_v40 = vand.u32 2139095040, %v2077_v33  ;;  %v816_v48 = vand.u32 2147483647, %v2077_v33 }
 0x228   : > { %v924_v42 = vshrl.u32 %v923_v37, 23  ;;  %v927_v16 = vand.u32 8388607, %v920_v35  ;;  %vm921_vm12 = vcmp.le.f32.partialorder %v920_v35, 0.7853982 }
 0x229   : > { %v820_v17 = vshrl.u32 %v819_v40, 23  ;;  %v2091_v56 = vand.u32 8388607, %v816_v48 }
 0x22a   : > { %v1579_v38 = vadd.s32 4294967169, %v924_v42  ;;  %v928_v46 = vor.u32 8388608, %v927_v16 }
 0x22b   : > { %v1575_v44 = vadd.s32 4294967169, %v820_v17 }
 0x22c   : > { %v930_v45 = vadd.s32 1, %v1579_v38  ;;  %v2085_v54 = vshll.u32 %v928_v46, 8 }
 0x22d   : > { %v826_v47 = vadd.s32 1, %v1575_v44  ;;  %v824_v44 = vor.u32 8388608, %v2091_v56 }
 0x22e   : > { %vm931_vm13 = vcmp.gt.s32.totalorder %v930_v45, 0 }
 0x22f   : > { %v932_v49 = vsel %vm931_vm13, %v930_v45, 0  ;;  %vm827_vm14 = vcmp.gt.s32.totalorder %v826_v47, 0  ;;  %vm922_vm13 = vcmp.lt.s32.totalorder %v2074_v32, 0 }
 0x230   : > { %v933_v51 = vshrl.u32 %v932_v49, 5  ;;  %v934_v52 = vand.u32 31, %v932_v49  ;;  %v828_v53 = vsel %vm827_vm14, %v826_v47, 0  ;;  %vm818_vm14 = vcmp.lt.s32.totalorder %v2077_v33, 0 }
 0x231   : > { %v2087_v55 = vshrl.u32 %v828_v53, 5  ;;  %v830_v61 = vand.u32 31, %v828_v53 }
 0x232   : > { %v935_v57 = vsub.s32 32, %v934_v52  ;;  %v937_v58 = vshll.u32 %v1816_v34, %v934_v52  ;;  %v940_v59 = vshll.u32 %v1817_v36, %v934_v52  ;;  %v943_v62 = vshll.u32 %v1818_v39, %v934_v52 }
 0x233   : > { %v946_v14 = vshll.u32 %v1819_v41, %v934_v52  ;;  %v949_v63 = vshll.u32 %v1820_v43, %v934_v52  ;;  %vm952_vm15 = vcmp.lt.s32.totalorder %v933_v51, 1  ;;  %vm953_vm0 = vcmp.lt.s32.totalorder %v933_v51, 2 }
 0x234   : > { %v938_v60 = vshrl.u32 %v1817_v36, %v935_v57  ;;  %v941_v0 = vshrl.u32 %v1818_v39, %v935_v57  ;;  %v944_v1 = vshrl.u32 %v1819_v41, %v935_v57  ;;  %v936_v2 = vshrl.u32 %v1816_v34, %v935_v57 }
 0x235   : > { %v947_v3 = vshrl.u32 %v1820_v43, %v935_v57  ;;  %v950_v4 = vshrl.u32 %v1821_v50, %v935_v57  ;;  %vm954_vm1 = vcmp.lt.s32.totalorder %v933_v51, 3  ;;  %v831_v10 = vsub.s32 32, %v830_v61 }
 0x236   : > { %v939_v5 = vor.u32 %v938_v60, %v937_v58  ;;  %v942_v6 = vor.u32 %v941_v0, %v940_v59  ;;  %v945_v7 = vor.u32 %v944_v1, %v943_v62  ;;  %vm955_vm2 = vcmp.lt.s32.totalorder %v933_v51, 4 }
 0x237   : > { %v948_v25 = vor.u32 %v947_v3, %v946_v14  ;;  %v951_v9 = vor.u32 %v950_v4, %v949_v63  ;;  %v842_v11 = vshll.u32 %v1819_v41, %v830_v61  ;;  %v843_v23 = vshrl.u32 %v1820_v43, %v831_v10 }
 0x238   : > { %v956_v31 = vsel %vm952_vm15, %v936_v2, %v939_v5  ;;  %v957_v15 = vsel %vm955_vm2, %v945_v7, 2102212464  ;;  %v960_v18 = vsel %vm952_vm15, %v939_v5, %v942_v6  ;;  %v964_v19 = vsel %vm952_vm15, %v942_v6, %v945_v7 }
 0x239   : > { %v958_v20 = vsel %vm954_vm1, %v942_v6, %v957_v15  ;;  %v961_v21 = vsel %vm955_vm2, %v948_v25, 920167782  ;;  %v965_v22 = vsel %vm955_vm2, %v951_v9, 1326507024  ;;  %v846_v13 = vshrl.u32 %v1821_v50, %v831_v10 }
 0x23a   : > { %v959_v12 = vsel %vm953_vm0, %v956_v31, %v958_v20  ;;  %v962_v24 = vsel %vm954_vm1, %v945_v7, %v961_v21  ;;  %v966_v26 = vsel %vm954_vm1, %v948_v25, %v965_v22  ;;  %v844_v29 = vor.u32 %v843_v23, %v842_v11 }
 0x23b   : > { %v963_v27 = vsel %vm953_vm0, %v960_v18, %v962_v24  ;;  %v967_v28 = vsel %vm953_vm0, %v964_v19, %v966_v26  ;;  %v845_v30 = vshll.u32 %v1820_v43, %v830_v61  ;;  %v975_v17 = vmul.u32 %v2085_v54, %v959_v12 }
 0x23c   : > { %v2118_v37 = vmul.u32.u64.low %v2085_v54, %v967_v28  ;;  %v2119_v40 = vmul.u32.u64.high %v2085_v54, %v967_v28, %v2118_v37  ;;  %v2122_v42 = vmul.u32.u64.low %v2085_v54, %v963_v27  ;;  %v2123_v16 = vmul.u32.u64.high %v2085_v54, %v963_v27, %v2122_v42 }
 0x23d   : > { %v847_v38 = vor.u32 %v846_v13, %v845_v30  ;;  %vm851_vm3 = vcmp.lt.s32.totalorder %v2087_v55, 4  ;;  %v833_v45 = vshll.u32 %v1816_v34, %v830_v61  ;;  %v834_v46 = vshrl.u32 %v1817_v36, %v831_v10 }
 0x23e   : > { %v837_v47 = vshrl.u32 %v1818_v39, %v831_v10  ;;  %v836_v51 = vshll.u32 %v1817_v36, %v830_v61  ;;  %v839_v52 = vshll.u32 %v1818_v39, %v830_v61  ;;  %v840_v53 = vshrl.u32 %v1819_v41, %v831_v10 }
 0x23f   : > { %v861_v49 = vsel %vm851_vm3, %v847_v38, 1326507024  ;;  %vm977_vm4 = vc.u32 %v2119_v40, %v2122_v42  ;;  %v978_v54 = vadd.s32 1, %v2123_v16  ;;  %v857_v56 = vsel %vm851_vm3, %v844_v29, 920167782 }
 0x240   : > { %v835_v57 = vor.u32 %v834_v46, %v833_v45  ;;  %v832_v58 = vshrl.u32 %v1816_v34, %v831_v10  ;;  %v838_v59 = vor.u32 %v837_v47, %v836_v51  ;;  %v841_v62 = vor.u32 %v840_v53, %v839_v52 }
 0x241   : > { %vm850_vm5 = vcmp.lt.s32.totalorder %v2087_v55, 3  ;;  %v979_v14 = vsel %vm977_vm4, %v978_v54, %v2123_v16  ;;  %vm848_vm6 = vcmp.lt.s32.totalorder %v2087_v55, 1  ;;  %vm849_vm7 = vcmp.lt.s32.totalorder %v2087_v55, 2 }
 0x242   : > { %v862_v61 = vsel %vm850_vm5, %v844_v29, %v861_v49  ;;  %v980_v63 = vadd.s32 %v979_v14, %v975_v17  ;;  %v853_v60 = vsel %vm851_vm3, %v841_v62, 2102212464  ;;  %v856_v0 = vsel %vm848_vm6, %v835_v57, %v838_v59 }
 0x243   : > { %v858_v1 = vsel %vm850_vm5, %v841_v62, %v857_v56  ;;  %v860_v3 = vsel %vm848_vm6, %v838_v59, %v841_v62  ;;  %v864_v4 = vshll.u32 %v824_v44, 8  ;;  %v852_v6 = vsel %vm848_vm6, %v832_v58, %v835_v57 }
 0x244   : > { %v859_v2 = vsel %vm849_vm7, %v856_v0, %v858_v1  ;;  %v981_v5 = vadd.s32 536870912, %v980_v63  ;;  %v854_v7 = vsel %vm850_vm5, %v838_v59, %v853_v60  ;;  %v863_v10 = vsel %vm849_vm7, %v860_v3, %v862_v61 }
 0x245   : > { %v2151_v25 = vmul.u32.u64.low %v864_v4, %v863_v10  ;;  %v2152_v9 = vmul.u32.u64.high %v864_v4, %v863_v10, %v2151_v25  ;;  %v2154_v11 = vmul.u32.u64.low %v864_v4, %v859_v2  ;;  %v2155_v31 = vmul.u32.u64.high %v864_v4, %v859_v2, %v2154_v11 }
 0x246   : > { %v982_v15 = vshrl.u32 %v981_v5, 30  ;;  %v855_v18 = vsel %vm849_vm7, %v852_v6, %v854_v7  ;;  %v976_v16 = vadd.s32 %v2122_v42, %v2119_v40  ;;  %vm817_vm15 = vcmp.le.f32.partialorder %v816_v48, 0.7853982 }
 0x247   : > { %vm873_vm8 = vc.u32 %v2152_v9, %v2154_v11  ;;  %v874_v20 = vadd.s32 1, %v2155_v31  ;;  %v871_v22 = vmul.u32 %v864_v4, %v855_v18  ;;  %v872_v40 = vadd.s32 %v2154_v11, %v2152_v9 }
 0x248   : > { %v983_v19 = vshll.u32 %v982_v15, 30  ;;  %v1006_v62 = vsub.s32 4, %v982_v15  ;;  %vm1012_vm3 = vweird.f32 %v2074_v32  ;;  %vm908_vm7 = vweird.f32 %v2077_v33 }
 0x249   : > { %v875_v23 = vsel %vm873_vm8, %v874_v20, %v2155_v31 }
 0x24a   : > { %v984_v21 = vsub.s32 %v980_v63, %v983_v19  ;;  %v876_v24 = vadd.s32 %v875_v23, %v871_v22  ;;  %v1007_v5 = vsel %vm922_vm13, %v1006_v62, %v982_v15  ;;  %v1583_v62 = vld [vmem:[%s2357_s9] ss:$0 sm:$0xff] }
 0x24b   : > { %v1009_v10 = vsel %vm921_vm12, 0, %v1007_v5 }
 0x24c   : > { %v986_v12 = vsub.s32 0, %v984_v21  ;;  %v877_v13 = vadd.s32 536870912, %v876_v24  ;;  %v1013_v18 = vadd.s32 3, %v1009_v10 }
 0x24e   : > { %v1580_v26 = vmin.u32 %v986_v12, %v984_v21  ;;  %v878_v28 = vshrl.u32 %v877_v13, 30  ;;  %v1014_v15 = vand.u32 3, %v1013_v18 }
 0x250   : > { %v988_v27 = vclz %v1580_v26  ;;  %v879_v30 = vshll.u32 %v878_v28, 30  ;;  %v902_v31 = vsub.s32 4, %v878_v28  ;;  %vm1019_vm0 = vcmp.eq.s32.totalorder %v1014_v15, 2 }
 0x251   : > { %vm1016_vm1 = vcmp.eq.s32.totalorder %v1014_v15, 0  ;;  %vm1015_vm2 = vcmp.lt.s32.totalorder %v1014_v15, 2 }
 0x252   : > { %v1581_v29 = vadd.s32 4294967294, %v988_v27  ;;  %v880_v55 = vsub.s32 %v876_v24, %v879_v30  ;;  %v903_v20 = vsel %vm818_vm14, %v902_v31, %v878_v28 }
 0x253   : > { %v905_v12 = vsel %vm817_vm15, 0, %v903_v20 }
 0x254   : > { %vm1582_vm9 = vcmp.lt.s32.totalorder %v1581_v29, 0  ;;  %v882_v44 = vsub.s32 0, %v880_v55  ;;  %v909_v27 = vadd.s32 3, %v905_v12 }
 0x255   : > { %v991_v37 = vsel %vm1582_vm9, 0, %v1581_v29 }
 0x256   : > { %v992_v17 = vsub.s32 32, %v991_v37  ;;  %v996_v38 = vsub.s32 4294967266, %v991_v37  ;;  %v993_v45 = vshll.u32 %v984_v21, %v991_v37  ;;  %v1576_v49 = vmin.u32 %v882_v44, %v880_v55 }
 0x257   : > { %v910_v30 = vand.u32 3, %v909_v27 }
 0x258   : > { %v994_v46 = vshrl.u32 %v976_v16, %v992_v17  ;;  %v997_v47 = vadd.s32 127, %v996_v38  ;;  %v884_v53 = vclz %v1576_v49  ;;  %v1324_v49 = vld [vmem:[%s2358_s10] sm:$0xff] }
 0x259   : > { %vm915_vm4 = vcmp.eq.s32.totalorder %v910_v30, 2  ;;  %vm912_vm5 = vcmp.eq.s32.totalorder %v910_v30, 0  ;;  %vm911_vm6 = vcmp.lt.s32.totalorder %v910_v30, 2 }
 0x25a   : > { %v995_v51 = vor.u32 %v994_v46, %v993_v45  ;;  %v998_v52 = vshll.u32 %v997_v47, 23  ;;  %v1577_v56 = vadd.s32 4294967294, %v884_v53  ;;  %v1327_v47 = vld [vmem:[%s2358_s10 + $0x18] sm:$0xff] }
 0x25c   : > { %v999_v54 = vor.u32 4788187, %v998_v52  ;;  %v1002_v58 = vcvt.s32.f32 %v995_v51  ;;  %vm1578_vm10 = vcmp.lt.s32.totalorder %v1577_v56, 0  ;;  %v1822_v52 = vmov 0.0  }
 0x25d   : > { %v887_v59 = vsel %vm1578_vm10, 0, %v1577_v56  ;;  %1398 = vmatprep.mubr.f32.mxu1 %v1822_v52  ;;  %v1411_v56 = vld [vmem:[%s407_s14] sm:$0xff] }
 0x25e   : > { %v1000_v57 = vand.u32 2147483647, %v999_v54  ;;  %v888_v42 = vsub.s32 32, %v887_v59  ;;  %v892_v61 = vsub.s32 4294967266, %v887_v59  ;;  %v889_v60 = vshll.u32 %v880_v55, %v887_v59 }
 0x25f   : > { %v1823_v54 = vmov 0  }
 0x260   : > { %v1003_v14 = vmul.f32 %v1002_v58, %v1000_v57  ;;  %v890_v0 = vshrl.u32 %v872_v40, %v888_v42  ;;  %v893_v1 = vadd.s32 127, %v892_v61  ;;  %1719 = vset.pattern.permute.xlu0 %v1823_v54  ;;  %v1412_v57 = vld [vmem:[%s407_s14 + $0x8] sm:$0xff]  ;;  %v1413_v58 = vsub.f32 0.0, %v1411_v56 }
 0x261   : > { %v1414_v59 = vsub.f32 0.0, %v1412_v57 }
 0x262   : > { %v1004_v63 = vxor.u32 2147483648, %v1003_v14  ;;  %v891_v3 = vor.u32 %v890_v0, %v889_v60  ;;  %v894_v4 = vshll.u32 %v893_v1, 23  ;;  %1418 = vperm.xlu0 %1719, %v1413_v58  }
 0x264   : > { %v1005_v2 = vsel %vm922_vm13, %v1004_v63, %v1003_v14  ;;  %v895_v7 = vor.u32 4788187, %v894_v4  ;;  %v898_v9 = vcvt.s32.f32 %v891_v3 }
 0x265   : > { %v1008_v6 = vsel %vm921_vm12, %v2074_v32, %v1005_v2  ;;  %v1325_v32 = vld [vmem:[%s2358_s10 + $0x8] sm:$0xff] }
 0x266   : > { %1728 = vcosq.f32 %v1008_v6  ;;  %v896_v25 = vand.u32 2147483647, %v895_v7  ;;  %v1642_v51 = vpack.c.bf16 %v1327_v47, %v1325_v32  ;;  %1423 = vperm.xlu0 %1719, %v1414_v59  }
 0x267   : > { %1730 = vsinq.f32 %v1008_v6 }
 0x268   : > { %v899_v11 = vmul.f32 %v898_v9, %v896_v25  ;;  %1643 = vmatprep.subr.bf16.mxu1 %v1642_v51 }
 0x26a   : > { %v900_v19 = vxor.u32 2147483648, %v899_v11 }
 0x26c   : > { %v901_v35 = vsel %vm818_vm14, %v900_v19, %v899_v11 }
 0x26d   : > { %v904_v21 = vsel %vm817_vm15, %v2077_v33, %v901_v35  ;;  %v1326_v33 = vld [vmem:[%s2358_s10 + $0x10] sm:$0xff] }
 0x26e   : > { %1732 = vcosq.f32 %v904_v21  ;;  %v1644_v53 = vpack.c.bf16 %v1326_v33, %v1324_v49 }
 0x26f   : > { %1734 = vsinq.f32 %v904_v21 }
 0x270   : > { %v1729_v22 = vpop.eup %1728  ;;  %1645 = vmatpush1.bf16.msra.mxu1 %v1644_v53 }
 0x271   : > { %v1731_v23 = vpop.eup %1730  ;;  %v1020_v24 = vxor.u32 2147483648, %v1729_v22 }
 0x272   : > { %v1017_v26 = vxor.u32 2147483648, %v1731_v23 }
 0x273   : > { %v1021_v13 = vsel %vm1019_vm0, %v1020_v24, %v1731_v23 }
 0x274   : > { %v1018_v29 = vsel %vm1016_vm1, %v1729_v22, %v1017_v26 }
 0x275   : > { %v1022_v48 = vsel %vm1015_vm2, %v1018_v29, %v1021_v13 }
 0x276   : > { %v1023_v28 = vsel %vm1012_vm3, nan, %v1022_v48 }
 0x278   : > { %v1733_v55 = vpop.eup %1732 }
 0x279   : > { %v1735_v37 = vpop.eup %1734  ;;  %v916_v16 = vxor.u32 2147483648, %v1733_v55 }
 0x27a   : > { %v913_v17 = vxor.u32 2147483648, %v1735_v37 }
 0x27b   : > { %v917_v38 = vsel %vm915_vm4, %v916_v16, %v1735_v37 }
 0x27c   : > { %v914_v44 = vsel %vm912_vm5, %v1733_v55, %v913_v17 }
 0x27d   : > { %v918_v45 = vsel %vm911_vm6, %v914_v44, %v917_v38 }
 0x27e   : > { %v919_v46 = vsel %vm908_vm7, nan, %v918_v45 }
 0x27f   : > { %1631 = vmatprep.mubr.msk.f32.mxu0 %vm732_vm11, %v919_v46 }
 0x280   : > { %1632 = vmatmul.mubr.msk.f32.vlgmr.msra.gmra.mrb[4].mxu0 %vm732_vm11, %v1023_v28 }
 0x353   : > { %v1633_v14 = vpop.f32.mrb[4].mxu0 }
 0x354   : > { %v1111_v40 = vadd.f32 %v1633_v14, %v1583_v62  ;;  %v1105_v42 = vpop.f32.mrb[5].mxu0 }
 0x355   : > { %v1106_v61 = vadd.f32 %v1583_v62, %v1105_v42 }
 0x356   : > { %v2198_v63 = vmul.f32 %v1959_v8, %v1111_v40 }
 0x357   : > { %v2201_v60 = vmul.f32 %v1959_v8, %v1106_v61 }
 0x358   : > { %v1223_v0 = vand.u32 2139095040, %v2198_v63  ;;  %v1220_v6 = vand.u32 2147483647, %v2198_v63 }
 0x359   : > { %v1119_v1 = vand.u32 2139095040, %v2201_v60  ;;  %v1116_v2 = vand.u32 2147483647, %v2201_v60  ;;  %vm1118_vm7 = vcmp.lt.s32.totalorder %v2201_v60, 0 }
 0x35a   : > { %v1224_v3 = vshrl.u32 %v1223_v0, 23  ;;  %v2211_v8 = vand.u32 8388607, %v1220_v6 }
 0x35b   : > { %v1120_v4 = vshrl.u32 %v1119_v1, 23  ;;  %v1123_v10 = vand.u32 8388607, %v1116_v2 }
 0x35c   : > { %v1590_v5 = vadd.s32 4294967169, %v1224_v3  ;;  %v1228_v22 = vor.u32 8388608, %v2211_v8 }
 0x35d   : > { %v1586_v7 = vadd.s32 4294967169, %v1120_v4  ;;  %v1124_v31 = vor.u32 8388608, %v1123_v10 }
 0x35e   : > { %v1230_v25 = vadd.s32 1, %v1590_v5 }
 0x35f   : > { %v1126_v9 = vadd.s32 1, %v1586_v7  ;;  %v2218_v26 = vshll.u32 %v1124_v31, 8 }
 0x360   : > { %vm1231_vm8 = vcmp.gt.s32.totalorder %v1230_v25, 0 }
 0x361   : > { %v1232_v11 = vsel %vm1231_vm8, %v1230_v25, 0  ;;  %vm1127_vm9 = vcmp.gt.s32.totalorder %v1126_v9, 0  ;;  %vm1117_vm8 = vcmp.le.f32.partialorder %v1116_v2, 0.7853982 }
 0x362   : > { %v1234_v18 = vand.u32 31, %v1232_v11  ;;  %v1128_v19 = vsel %vm1127_vm9, %v1126_v9, 0  ;;  %v2213_v35 = vshrl.u32 %v1232_v11, 5  ;;  %vm1222_vm9 = vcmp.lt.s32.totalorder %v2198_v63, 0 }
 0x363   : > { %v1130_v20 = vand.u32 31, %v1128_v19  ;;  %v1129_v21 = vshrl.u32 %v1128_v19, 5 }
 0x364   : > { %v1235_v15 = vsub.s32 32, %v1234_v18  ;;  %v1246_v23 = vshll.u32 %v1819_v41, %v1234_v18  ;;  %v1249_v12 = vshll.u32 %v1820_v43, %v1234_v18  ;;  %vm1255_vm10 = vcmp.lt.s32.totalorder %v2213_v35, 4 }
 0x365   : > { %v1131_v24 = vsub.s32 32, %v1130_v20  ;;  %v1142_v29 = vshll.u32 %v1819_v41, %v1130_v20  ;;  %v1145_v48 = vshll.u32 %v1820_v43, %v1130_v20  ;;  %v1133_v55 = vshll.u32 %v1816_v34, %v1130_v20 }
 0x366   : > { %v1247_v13 = vshrl.u32 %v1820_v43, %v1235_v15  ;;  %v1250_v27 = vshrl.u32 %v1821_v50, %v1235_v15  ;;  %vm1151_vm12 = vcmp.lt.s32.totalorder %v1129_v21, 4  ;;  %v1136_v16 = vshll.u32 %v1817_v36, %v1130_v20 }
 0x367   : > { %v1143_v28 = vshrl.u32 %v1820_v43, %v1131_v24  ;;  %v1146_v30 = vshrl.u32 %v1821_v50, %v1131_v24  ;;  %v1134_v37 = vshrl.u32 %v1817_v36, %v1131_v24  ;;  %v1137_v17 = vshrl.u32 %v1818_v39, %v1131_v24 }
 0x368   : > { %v1139_v38 = vshll.u32 %v1818_v39, %v1130_v20  ;;  %v1140_v32 = vshrl.u32 %v1819_v41, %v1131_v24  ;;  %v1248_v47 = vor.u32 %v1247_v13, %v1246_v23  ;;  %v1251_v43 = vor.u32 %v1250_v27, %v1249_v12 }
 0x369   : > { %v1144_v44 = vor.u32 %v1143_v28, %v1142_v29  ;;  %v1147_v45 = vor.u32 %v1146_v30, %v1145_v48  ;;  %v1135_v46 = vor.u32 %v1134_v37, %v1133_v55  ;;  %v1132_v50 = vshrl.u32 %v1816_v34, %v1131_v24 }
 0x36a   : > { %v1138_v49 = vor.u32 %v1137_v17, %v1136_v16  ;;  %v1141_v53 = vor.u32 %v1140_v32, %v1139_v38  ;;  %vm1148_vm13 = vcmp.lt.s32.totalorder %v1129_v21, 1  ;;  %vm1149_vm14 = vcmp.lt.s32.totalorder %v1129_v21, 2 }
 0x36b   : > { %v1157_v51 = vsel %vm1151_vm12, %v1144_v44, 920167782  ;;  %v1161_v33 = vsel %vm1151_vm12, %v1147_v45, 1326507024  ;;  %vm1150_vm15 = vcmp.lt.s32.totalorder %v1129_v21, 3  ;;  %v1152_v54 = vsel %vm1148_vm13, %v1132_v50, %v1135_v46 }
 0x36c   : > { %v1156_v56 = vsel %vm1148_vm13, %v1135_v46, %v1138_v49  ;;  %v1153_v57 = vsel %vm1151_vm12, %v1141_v53, 2102212464  ;;  %v1158_v58 = vsel %vm1150_vm15, %v1141_v53, %v1157_v51  ;;  %v1160_v59 = vsel %vm1148_vm13, %v1138_v49, %v1141_v53 }
 0x36d   : > { %v1162_v62 = vsel %vm1150_vm15, %v1144_v44, %v1161_v33  ;;  %v1154_v14 = vsel %vm1150_vm15, %v1138_v49, %v1153_v57  ;;  %v1159_v40 = vsel %vm1149_vm14, %v1156_v56, %v1158_v58  ;;  %v1237_v61 = vshll.u32 %v1816_v34, %v1234_v18 }
 0x36e   : > { %v1163_v42 = vsel %vm1149_vm14, %v1160_v59, %v1162_v62  ;;  %v1155_v0 = vsel %vm1149_vm14, %v1152_v54, %v1154_v14  ;;  %v1238_v4 = vshrl.u32 %v1817_v36, %v1235_v15  ;;  %v1265_v5 = vsel %vm1255_vm10, %v1251_v43, 1326507024 }
 0x36f   : > { %v2239_v1 = vmul.u32.u64.low %v2218_v26, %v1163_v42  ;;  %v2240_v3 = vmul.u32.u64.high %v2218_v26, %v1163_v42, %v2239_v1  ;;  %v2246_v7 = vmul.u32.u64.low %v2218_v26, %v1159_v40  ;;  %v2247_v10 = vmul.u32.u64.high %v2218_v26, %v1159_v40, %v2246_v7 }
 0x370   : > { %v1240_v25 = vshll.u32 %v1817_v36, %v1234_v18  ;;  %v1239_v9 = vor.u32 %v1238_v4, %v1237_v61  ;;  %v1241_v8 = vshrl.u32 %v1818_v39, %v1235_v15  ;;  %v1243_v11 = vshll.u32 %v1818_v39, %v1234_v18 }
 0x371   : > { %v1244_v31 = vshrl.u32 %v1819_v41, %v1235_v15  ;;  %v1261_v19 = vsel %vm1255_vm10, %v1248_v47, 920167782  ;;  %v1171_v20 = vmul.u32 %v2218_v26, %v1155_v0  ;;  %v1236_v21 = vshrl.u32 %v1816_v34, %v1235_v15 }
 0x372   : > { %v1268_v23 = vshll.u32 %v1228_v22, 8  ;;  %vm1173_vm0 = vc.u32 %v2240_v3, %v2246_v7  ;;  %v1242_v12 = vor.u32 %v1241_v8, %v1240_v25  ;;  %vm1254_vm1 = vcmp.lt.s32.totalorder %v2213_v35, 3 }
 0x373   : > { %v1245_v24 = vor.u32 %v1244_v31, %v1243_v11  ;;  %v1174_v36 = vadd.s32 1, %v2247_v10  ;;  %vm1252_vm2 = vcmp.lt.s32.totalorder %v2213_v35, 1  ;;  %vm1253_vm3 = vcmp.lt.s32.totalorder %v2213_v35, 2 }
 0x374   : > { %v1266_v39 = vsel %vm1254_vm1, %v1248_v47, %v1265_v5  ;;  %v1260_v18 = vsel %vm1252_vm2, %v1239_v9, %v1242_v12  ;;  %v1256_v22 = vsel %vm1252_vm2, %v1236_v21, %v1239_v9  ;;  %v1172_v59 = vadd.s32 %v2246_v7, %v2240_v3 }
 0x375   : > { %v1257_v41 = vsel %vm1255_vm10, %v1245_v24, 2102212464  ;;  %v1262_v26 = vsel %vm1254_vm1, %v1245_v24, %v1261_v19  ;;  %v1264_v34 = vsel %vm1252_vm2, %v1242_v12, %v1245_v24  ;;  %v1175_v15 = vsel %vm1173_vm0, %v1174_v36, %v2247_v10 }
 0x376   : > { %v1263_v13 = vsel %vm1253_vm3, %v1260_v18, %v1262_v26  ;;  %v1267_v27 = vsel %vm1253_vm3, %v1264_v34, %v1266_v39  ;;  %v1176_v29 = vadd.s32 %v1175_v15, %v1171_v20  ;;  %v1258_v48 = vsel %vm1254_vm1, %v1242_v12, %v1257_v41 }
 0x377   : > { %v2269_v28 = vmul.u32.u64.low %v1268_v23, %v1267_v27  ;;  %v2270_v30 = vmul.u32.u64.high %v1268_v23, %v1267_v27, %v2269_v28  ;;  %v2272_v55 = vmul.u32.u64.low %v1268_v23, %v1263_v13  ;;  %v2273_v37 = vmul.u32.u64.high %v1268_v23, %v1263_v13, %v2272_v55 }
 0x378   : > { %v1177_v16 = vadd.s32 536870912, %v1176_v29  ;;  %v1259_v17 = vsel %vm1253_vm3, %v1256_v22, %v1258_v48  ;;  %vm1221_vm10 = vcmp.le.f32.partialorder %v1220_v6, 0.7853982  ;;  %vm1208_vm15 = vweird.f32 %v2201_v60 }
 0x379   : > { %vm1277_vm4 = vc.u32 %v2270_v30, %v2272_v55  ;;  %v1278_v44 = vadd.s32 1, %v2273_v37  ;;  %v1275_v46 = vmul.u32 %v1268_v23, %v1259_v17  ;;  %v1276_v31 = vadd.s32 %v2272_v55, %v2270_v30 }
 0x37a   : > { %v1178_v38 = vshrl.u32 %v1177_v16, 30  ;;  %vm1312_vm3 = vweird.f32 %v2198_v63 }
 0x37b   : > { %v1279_v32 = vsel %vm1277_vm4, %v1278_v44, %v2273_v37 }
 0x37c   : > { %v1179_v45 = vshll.u32 %v1178_v38, 30  ;;  %v1280_v43 = vadd.s32 %v1279_v32, %v1275_v46  ;;  %v1202_v7 = vsub.s32 4, %v1178_v38 }
 0x37e   : > { %v1180_v47 = vsub.s32 %v1176_v29, %v1179_v45  ;;  %v1281_v49 = vadd.s32 536870912, %v1280_v43  ;;  %v1203_v18 = vsel %vm1118_vm7, %v1202_v7, %v1178_v38 }
 0x37f   : > { %v1205_v15 = vsel %vm1117_vm8, 0, %v1203_v18 }
 0x380   : > { %v1182_v50 = vsub.s32 0, %v1180_v47  ;;  %v1282_v33 = vshrl.u32 %v1281_v49, 30  ;;  %v1209_v48 = vadd.s32 3, %v1205_v15 }
 0x382   : > { %v1587_v51 = vmin.u32 %v1182_v50, %v1180_v47  ;;  %v1283_v54 = vshll.u32 %v1282_v33, 30  ;;  %v1306_v29 = vsub.s32 4, %v1282_v33  ;;  %v1210_v55 = vand.u32 3, %v1209_v48 }
 0x384   : > { %v1184_v53 = vclz %v1587_v51  ;;  %v1284_v35 = vsub.s32 %v1280_v43, %v1283_v54  ;;  %v1307_v30 = vsel %vm1222_vm9, %v1306_v29, %v1282_v33  ;;  %vm1215_vm12 = vcmp.eq.s32.totalorder %v1210_v55, 2 }
 0x385   : > { %v1309_v17 = vsel %vm1221_vm10, 0, %v1307_v30  ;;  %vm1212_vm13 = vcmp.eq.s32.totalorder %v1210_v55, 0  ;;  %vm1211_vm14 = vcmp.lt.s32.totalorder %v1210_v55, 2 }
 0x386   : > { %v1588_v56 = vadd.s32 4294967294, %v1184_v53  ;;  %v1286_v58 = vsub.s32 0, %v1284_v35  ;;  %v1313_v32 = vadd.s32 3, %v1309_v17 }
 0x388   : > { %vm1589_vm5 = vcmp.lt.s32.totalorder %v1588_v56, 0  ;;  %v1591_v40 = vmin.u32 %v1286_v58, %v1284_v35  ;;  %v1314_v50 = vand.u32 3, %v1313_v32 }
 0x389   : > { %v1187_v57 = vsel %vm1589_vm5, 0, %v1588_v56 }
 0x38a   : > { %v1188_v62 = vsub.s32 32, %v1187_v57  ;;  %v1192_v14 = vsub.s32 4294967266, %v1187_v57  ;;  %v1189_v42 = vshll.u32 %v1180_v47, %v1187_v57  ;;  %v1288_v1 = vclz %v1591_v40 }
 0x38b   : > { %vm1319_vm0 = vcmp.eq.s32.totalorder %v1314_v50, 2  ;;  %vm1316_vm1 = vcmp.eq.s32.totalorder %v1314_v50, 0  ;;  %vm1315_vm2 = vcmp.lt.s32.totalorder %v1314_v50, 2  ;;  %v1427_v57 = vlaneseq }
 0x38c   : > { %v1190_v61 = vshrl.u32 %v1172_v59, %v1188_v62  ;;  %v1193_v0 = vadd.s32 127, %v1192_v14  ;;  %v1592_v10 = vadd.s32 4294967294, %v1288_v1 }
 0x38d   : > { %v1428_v58 = vshrl.u32 %v1427_v57, 7 }
 0x38e   : > { %v1191_v4 = vor.u32 %v1190_v61, %v1189_v42  ;;  %v1194_v5 = vshll.u32 %v1193_v0, 23  ;;  %vm1593_vm6 = vcmp.lt.s32.totalorder %v1592_v10, 0  ;;  %v1419_v42 = vpop.permute.xlu0 %1418 }
 0x38f   : > { %v1291_v11 = vsel %vm1593_vm6, 0, %v1592_v10  ;;  %v1429_v59 = vsub.s32 0, %v1428_v58  ;;  %v1433_v62 = vsub.s32 1, %v1428_v58 }
 0x390   : > { %v1195_v25 = vor.u32 4788187, %v1194_v5  ;;  %v1198_v8 = vcvt.s32.f32 %v1191_v4  ;;  %v1292_v19 = vsub.s32 32, %v1291_v11  ;;  %v1296_v20 = vsub.s32 4294967266, %v1291_v11 }
 0x391   : > { %v1293_v21 = vshll.u32 %v1284_v35, %v1291_v11 }
 0x392   : > { %v1196_v9 = vand.u32 2147483647, %v1195_v25  ;;  %v1294_v23 = vshrl.u32 %v1276_v31, %v1292_v19  ;;  %v1297_v12 = vadd.s32 127, %v1296_v20  ;;  %v1424_v4 = vpop.permute.xlu0 %1423 }
 0x394   : > { %v1199_v3 = vmul.f32 %v1198_v8, %v1196_v9  ;;  %v1295_v36 = vor.u32 %v1294_v23, %v1293_v21  ;;  %v1298_v39 = vshll.u32 %v1297_v12, 23 }
 0x396   : > { %v1200_v24 = vxor.u32 2147483648, %v1199_v3  ;;  %v1299_v34 = vor.u32 4788187, %v1298_v39  ;;  %v1302_v13 = vcvt.s32.f32 %v1295_v36 }
 0x398   : > { %v1201_v41 = vsel %vm1118_vm7, %v1200_v24, %v1199_v3  ;;  %v1300_v22 = vand.u32 2147483647, %v1299_v34 }
 0x399   : > { %v1204_v26 = vsel %vm1117_vm8, %v2201_v60, %v1201_v41 }
 0x39a   : > { %1736 = vcosq.f32 %v1204_v26  ;;  %v1303_v27 = vmul.f32 %v1302_v13, %v1300_v22 }
 0x39b   : > { %1738 = vsinq.f32 %v1204_v26 }
 0x39c   : > { %v1304_v28 = vxor.u32 2147483648, %v1303_v27 }
 0x39e   : > { %v1305_v2 = vsel %vm1222_vm9, %v1304_v28, %v1303_v27 }
 0x39f   : > { %v1308_v37 = vsel %vm1221_vm10, %v2198_v63, %v1305_v2 }
 0x3a0   : > { %1740 = vcosq.f32 %v1308_v37 }
 0x3a1   : > { %1742 = vsinq.f32 %v1308_v37 }
 0x3a4   : > { %v1737_v16 = vpop.eup %1736 }
 0x3a5   : > { %v1739_v38 = vpop.eup %1738  ;;  %v1216_v44 = vxor.u32 2147483648, %v1737_v16 }
 0x3a6   : > { %v1213_v45 = vxor.u32 2147483648, %v1739_v38 }
 0x3a7   : > { %v1217_v46 = vsel %vm1215_vm12, %v1216_v44, %v1739_v38 }
 0x3a8   : > { %v1214_v47 = vsel %vm1212_vm13, %v1737_v16, %v1213_v45 }
 0x3a9   : > { %v1218_v6 = vsel %vm1211_vm14, %v1214_v47, %v1217_v46 }
 0x3aa   : > { %v1219_v43 = vsel %vm1208_vm15, nan, %v1218_v6  ;;  %v1741_v49 = vpop.eup %1740 }
 0x3ab   : > { %1594 = vmatmul.mubr.msk.f32.vlgmr.msra.gmra.mrb[0].mxu1 %vm732_vm11, %v1219_v43  ;;  %v1743_v51 = vpop.eup %1742  ;;  %v1320_v33 = vxor.u32 2147483648, %v1741_v49 }
 0x3ac   : > { %1404 = vmatprep.mubr.f32.mxu1 %v1822_v52  ;;  %v1317_v53 = vxor.u32 2147483648, %v1743_v51  ;;  %v1415_v52 = vld [vmem:[%s2351_s3] sm:$0x3] }
 0x3ad   : > { %v1321_v54 = vsel %vm1319_vm0, %v1320_v33, %v1743_v51  ;;  %v1430_v14 = vrot.slane %v1415_v52, %v1429_v59  ;;  %v1434_v40 = vrot.slane %v1415_v52, %v1433_v62 }
 0x3ae   : > { %v1318_v56 = vsel %vm1316_vm1, %v1741_v49, %v1317_v53 }
 0x3af   : > { %v1322_v35 = vsel %vm1315_vm2, %v1318_v56, %v1321_v54  ;;  %v1437_v61 = vmul.f32 %v1430_v14, %v1419_v42  ;;  %v1438_v0 = vmul.f32 %v1434_v40, %v1419_v42  ;;  %v1439_v5 = vmul.f32 %v1430_v14, %v1424_v4 }
 0x3b0   : > { %v1323_v60 = vsel %vm1312_vm3, nan, %v1322_v35  ;;  %v1440_v10 = vmul.f32 %v1434_v40, %v1424_v4 }
 0x3b1   : > { %1595 = vmatmul.mubr.msk.f32.gmra.mrb[2].mxu1 %vm732_vm11, %v1323_v60  ;;  %v1441_v1 = vmul.f32 1.442695, %v1437_v61  ;;  %v1443_v63 = vmul.f32 1.442695, %v1438_v0  ;;  %v1445_v25 = vmul.f32 1.442695, %v1439_v5 }
 0x3b2   : > { %v1447_v9 = vmul.f32 1.442695, %v1440_v10 }
 0x3b3   : > { %1744 = vpow2.f32 %v1441_v1 }
 0x3b4   : > { %1746 = vpow2.f32 %v1443_v63 }
 0x3b5   : > { %1748 = vpow2.f32 %v1445_v25 }
 0x3b6   : > { %1750 = vpow2.f32 %v1447_v9 }
 0x3bd   : > { %v1745_v8 = vpop.eup %1744 }
 0x3be   : > { %v1747_v11 = vpop.eup %1746  ;;  %v1449_v31 = vadd.f32 0.05, %v1745_v8 }
 0x3bf   : > { %v1450_v19 = vadd.f32 0.05, %v1747_v11  ;;  %v1749_v23 = vpop.eup %1748 }
 0x3c0   : > { %v1751_v12 = vpop.eup %1750  ;;  %v1451_v24 = vadd.f32 0.05, %v1749_v23 }
 0x3c1   : > { %v1452_v39 = vadd.f32 0.05, %v1751_v12 }
 0x47e   : > { %v1400_v20 = vpop.f32.mrb[0].mxu1 }
 0x47f   : > { %v1453_v3 = vmul.f32 %v1449_v31, %v1400_v20  ;;  %v1402_v7 = vpop.f32.mrb[1].mxu1 }
 0x480   : > { %v1454_v21 = vmul.f32 %v1450_v19, %v1402_v7 }
 0x481   : > { %1457 = vst [vmem:[%s396_s24] sm:$0xff] %v1453_v3 }
 0x482   : > { %1458 = vst [vmem:[%s396_s24 + $0x8] sm:$0xff] %v1454_v21 }
 0x484   : > { %v1406_v36 = vpop.f32.mrb[2].mxu1 }
 0x485   : > { %v1455_v41 = vmul.f32 %v1451_v24, %v1406_v36  ;;  %v1408_v18 = vpop.f32.mrb[3].mxu1 }
 0x486   : > { %v1456_v26 = vmul.f32 %v1452_v39, %v1408_v18 }
 0x487   : > { %1459 = vst [vmem:[%s396_s24 + $0x10] sm:$0xff] %v1455_v41 }
 0x488   : > { %1460 = vst [vmem:[%s396_s24 + $0x18] sm:$0xff] %v1456_v26 }
 0x489   : > { %1765 = shalt.err (!%p1762_p3)
}
 0x48a   : > { %s1766_s16 = scalar_lea.hbm %s2305_s15, 512  ;;  %s1770_s30 = scalar_lea.hbm %s2359_s11, 2048 }
 0x48b   : > { %p1767_p4 = scmp.ne.s32.totalorder %s2305_s15, %s1766_s16  ;;  %p1771_p9 = scmp.lt.u32.totalorder %s2305_s15, %s2359_s11 }
 0x48c   : > { %p1772_p10 = scmp.lt.u32.totalorder %s1770_s30, %s1766_s16  ;;  %p1774_p12 = scmp.lt.u32.totalorder %s1766_s16, %s2305_s15 }
 0x48d   : > { %p1768_p7 = pnand %p1767_p4, %p1925_p5 }
 0x48e   : > { %p1773_p11 = por %p1772_p10, %p1771_p9 }
 0x48f   : > { %p1769_p8 = pneg %p1768_p7 }
 0x490   : > { %p1775_p13 = por %p1774_p12, %p1773_p11 }
 0x492   : > { %p1776_p0 = pnand %p1775_p13, %p1769_p8 }
 0x494   : > { %1779 = shalt.err (!%p1776_p0)
}
 0x495   : > { %s1825_s21 = smov 256   ;;  %s1826_s13 = smov 16  }
 0x496   : > { %1670 = dma.vmem_to_hbm [thread:$0]  (%p1925_p5), %s2300_s25, 512, %s2305_s15, %s2307_s4, %s1825_s21, %s1825_s21, %s1826_s13  }
 0x497 PF: > { %p1676_p1 = scmp.ge.s32.totalorder %s1814_s20, 2  ;;  %s1491_s22 = sand.u32 1, %s1802_s17  }
 0x498   : > { %s1492_s16 = scalar_lea.sflag [#allocation3], %s1491_s22 }
 0x499   : > { %p1673_p2 = pnand %p1676_p1, %p1929_p6 }
 0x49b   : > { %1797 = dma.done.wait (!%p1673_p2), %s1492_s16, 512  }
 0x49c   : > { %1799 = vsyncadd (!%p1673_p2), %s1492_s16, 4294966784  ;;  %p21_p3 = scmp.ge.s32.totalorder %s1912_s23, 6   ;;  %s2364_s17 = smov %s1806_s18 }
 0x49d   : > { %s2365_s18 = smov %s1810_s19  ;;  %s2366_s19 = smov %s1923_s26 }
 0x49e   : > { %s2367_s20 = smov %s1912_s23  ;;  %23 = sbr.rel (!%p21_p3) target bundleno = 5 (0x5), region = 102 }
 0x4a5   :  { %1497 = vsyncpa [#allocation3], 1 }
 0x4a6   :  { %1499 = vsyncpa [#allocation3 + $0x1], 1 }

</bundles_post_ra>
